<compile_context>
chip_gen: v7x
topology: tpu7x:2x2x1
jax: 0.10.0
libtpu: 0.0.40
codegen_flags: <defaults>
</compile_context>

<pallas_src>
import functools

import jax
import jax.numpy as jnp
import numpy as np
from jax import lax
from jax.experimental import pallas as pl
from jax.experimental.pallas import tpu as pltpu

_MINMAX_BLOCK_ELEMS = 2 * 1024 * 1024   # ~8 MiB f32 per block (input-only pass)
_QDQ_BLOCK_ELEMS = 1 * 1024 * 1024      # ~4 MiB f32; in + out double-buffered
_MAX_COL_TILE = 2048                    # lane-dense column tile (multiple of 128)
_MIN_LANES = 128
_VMEM_LIMIT_BYTES = 48 * 1024 * 1024    # explicit limit; v5e default is only 16 MiB
_MINMAX_SHARDS = 2                      # leading "parallel" axis -> v7x 2 TCs


# ----------------------------------------------------------------------------
# Tiling helpers
# ----------------------------------------------------------------------------
def _sublane_mult(dtype):
    """Sublane packing multiple: 8 for 4-byte, 16 for 2-byte, 32 for 1-byte."""
    return max(8, 32 // jnp.dtype(dtype).itemsize)


def _pick_lanes(total):
    for lanes in (2048, 1024, 512, 256, 128):
        if total % lanes == 0:
            return lanes
    return None


def _as_lane_dense_2d(x):
    """View the flat tensor as a lane-dense (rows, lanes) slab.

    When numel % 128 == 0 (virtually every NN tensor) this is a free reshape.
    """
    total = x.size
    x_flat = x.reshape(-1)
    lanes = _pick_lanes(total)
    if lanes is None:
        # TODO(synk): numel % 128 != 0 pays one pad copy (+ un-pad slice for qdq).
        lanes = _MIN_LANES
        padded = pl.cdiv(total, lanes) * lanes
        x_flat = jnp.pad(x_flat, (0, padded - total))
    return x_flat.reshape(-1, lanes), lanes, total


def _row_tile(rows, lanes, target_elems, dtype):
    """Row tile: full height if it fits, else a dtype-sublane-aligned tile."""
    sub = _sublane_mult(dtype)
    target = max(sub, ((target_elems // max(lanes, 1)) // sub) * sub)
    return rows if rows <= target else target


def _channels_last_2d(x):
    """(..., C) -> lane-dense (R/k, k*C) view with k = 128//C when that fits.

    Lane j of the widened view maps to channel j % C.  Free reshape under jit.
    """
    C = x.shape[-1]
    x2d = x.reshape(-1, C)
    R = x2d.shape[0]
    k = 1
    if C < 128 and 128 % C == 0:
        kk = 128 // C
        if R % kk == 0:
            k = kk
            x2d = x2d.reshape(R // kk, kk * C)
    return x2d, k


# ----------------------------------------------------------------------------
# Kernels
# ----------------------------------------------------------------------------
def _rowfold_minmax_kernel(x_ref, min_ref, max_ref, *, lanes, tile_r, total,
                           nblocks, fold_rows, needs_mask):
    """Streaming min/max reducing over rows.

    Each block is folded to an (8, lanes) partial (pure VPU) and accumulated
    into the resident output block; ragged-tail masking only on the last
    global block.  Grid = (shards, steps): shards is "parallel" (v7x 2 TCs).
    """
    i = pl.program_id(1)
    nsteps = pl.num_programs(1)
    gidx = pl.program_id(0) * nsteps + i

    def fold(xm, xM):
        if fold_rows:
            return (jnp.min(xm.reshape(-1, 8, lanes), axis=0),
                    jnp.max(xM.reshape(-1, 8, lanes), axis=0))
        return xm, xM

    def accum(pm, pM):
        @pl.when(i == 0)
        def _():
            min_ref[...] = pm
            max_ref[...] = pM

        @pl.when(i > 0)
        def _():
            min_ref[...] = jnp.minimum(min_ref[...], pm)
            max_ref[...] = jnp.maximum(max_ref[...], pM)

    x = x_ref[...].astype(jnp.float32)

    def masked_parts():
        rid = gidx * tile_r + lax.broadcasted_iota(jnp.int32, x.shape, 0)
        cid = lax.broadcasted_iota(jnp.int32, x.shape, 1)
        valid = rid * lanes + cid < total
        return fold(jnp.where(valid, x, jnp.inf), jnp.where(valid, x, -jnp.inf))

    if not needs_mask:
        accum(*fold(x, x))
    elif nblocks == 1:
        accum(*masked_parts())
    else:
        @pl.when(gidx < nblocks - 1)
        def _():
            accum(*fold(x, x))

        @pl.when(gidx == nblocks - 1)
        def _():
            accum(*masked_parts())


def _lanefold_minmax_kernel(x_ref, min_ref, max_ref, *, tile_c, part_w, rest,
                            needs_mask):
    """Per-channel (channels-on-sublanes) min/max.

    Folds each (tile_r, tile_c) block into a (tile_r, part_w) partial by
    elementwise mins/maxes of lane groups (pure VPU, zero-cost ref slices) and
    accumulates into the resident output block; the 128->1 cross-lane reduce
    happens once in JAX glue.  Ragged-lane masking only on the last j block.
    """
    j = pl.program_id(1)
    nj = pl.num_programs(1)
    ngroups = tile_c // part_w

    def fold_ref():
        pm = x_ref[:, 0:part_w].astype(jnp.float32)
        pM = pm
        for g in range(1, ngroups):
            blk = x_ref[:, g * part_w:(g + 1) * part_w].astype(jnp.float32)
            pm = jnp.minimum(pm, blk)
            pM = jnp.maximum(pM, blk)
        return pm, pM

    def fold_masked():
        x = x_ref[...].astype(jnp.float32)
        cid = j * tile_c + lax.broadcasted_iota(jnp.int32, x.shape, 1)
        valid = cid < rest
        xm = jnp.where(valid, x, jnp.inf)
        xM = jnp.where(valid, x, -jnp.inf)
        pm = xm[:, 0:part_w]
        pM = xM[:, 0:part_w]
        for g in range(1, ngroups):
            pm = jnp.minimum(pm, xm[:, g * part_w:(g + 1) * part_w])
            pM = jnp.maximum(pM, xM[:, g * part_w:(g + 1) * part_w])
        return pm, pM

    def accum(pm, pM):
        @pl.when(j == 0)
        def _():
            min_ref[...] = pm
            max_ref[...] = pM

        @pl.when(j > 0)
        def _():
            min_ref[...] = jnp.minimum(min_ref[...], pm)
            max_ref[...] = jnp.maximum(max_ref[...], pM)

    if not needs_mask:
        accum(*fold_ref())
    else:
        @pl.when(j < nj - 1)
        def _():
            accum(*fold_ref())

        @pl.when(j == nj - 1)
        def _():
            accum(*fold_masked())


def _tensorwise_qdq_kernel(scale_ref, x_ref, o_ref):
    """QDQ with packed SMEM scalars [1/delta, delta, -zp, n-1-zp]."""
    x = x_ref[...].astype(jnp.float32)
    x_q = jnp.clip(jnp.round(x * scale_ref[0]), scale_ref[2], scale_ref[3])
    o_ref[...] = (x_q * scale_ref[1]).astype(o_ref.dtype)


def _channel_qdq_kernel(scale_ref, x_ref, o_ref, *, channel_axis):
    """Per-channel QDQ; packed scales [1/d, d, -z, n-1-z] broadcast from one ref."""
    x = x_ref[...].astype(jnp.float32)
    if channel_axis == 0:                    # channels on sublanes: (tile_r, 4)
        inv_d = scale_ref[:, 0:1]
        d = scale_ref[:, 1:2]
        lo = scale_ref[:, 2:3]
        hi = scale_ref[:, 3:4]
    else:                                    # channels on lanes: (4, Ceff)
        inv_d = scale_ref[0:1, :]
        d = scale_ref[1:2, :]
        lo = scale_ref[2:3, :]
        hi = scale_ref[3:4, :]
    x_q = jnp.clip(jnp.round(x * inv_d), lo, hi)
    o_ref[...] = (x_q * d).astype(o_ref.dtype)


# ----------------------------------------------------------------------------
# Pallas wrappers (jitted so the 2D reshapes are free / fused)
# ----------------------------------------------------------------------------
def _minmax_partials(x2d, lanes, total, dtype):
    """Row-reduce min/max partials of shape (shards*P, lanes), P = 8 or rows."""
    rows = x2d.shape[0]
    tile_r = _row_tile(rows, lanes, _MINMAX_BLOCK_ELEMS, dtype)
    nblocks = pl.cdiv(rows, tile_r)
    fold_rows = (tile_r % 8 == 0)
    part_rows = 8 if fold_rows else tile_r
    needs_mask = (rows % tile_r != 0) or (rows * lanes != total)
    nc = _MINMAX_SHARDS if (nblocks % _MINMAX_SHARDS == 0
                            and nblocks >= 2 * _MINMAX_SHARDS) else 1
    nsteps = nblocks // nc

    kern = functools.partial(
        _rowfold_minmax_kernel, lanes=lanes, tile_r=tile_r, total=total,
        nblocks=nblocks, fold_rows=fold_rows, needs_mask=needs_mask)
    out_sh = jax.ShapeDtypeStruct((nc * part_rows, lanes), jnp.float32)
    pmin, pmax = pl.pallas_call(
        kern,
        out_shape=(out_sh, out_sh),
        grid=(nc, nsteps),
        in_specs=[pl.BlockSpec((tile_r, lanes),
                               lambda c, i: (c * nsteps + i, 0))],
        out_specs=(pl.BlockSpec((part_rows, lanes), lambda c, i: (c, 0)),
                   pl.BlockSpec((part_rows, lanes), lambda c, i: (c, 0))),
        compiler_params=pltpu.CompilerParams(
            dimension_semantics=("parallel", "arbitrary"),
            vmem_limit_bytes=_VMEM_LIMIT_BYTES),
    )(x2d)
    return pmin, pmax


@jax.jit
def _minmax_tensorwise(x):
    x2d, lanes, total = _as_lane_dense_2d(x)
    pmin, pmax = _minmax_partials(x2d, lanes, total, x.dtype)
    return jnp.min(pmin), jnp.max(pmax)


@jax.jit
def _minmax_channelwise(x):
    """Per-channel min / max, returned as flat (C,) f32 arrays."""
    if x.ndim in (2, 4):
        # channel dim 0 -> channels on the sublane axis: (C, rest)
        C = x.shape[0]
        x2d = x.reshape(C, -1)
        rest = x2d.shape[1]
        tile_c = rest if rest <= _MAX_COL_TILE else _MAX_COL_TILE
        part_w = 128 if tile_c % 128 == 0 else tile_c
        tile_r = _row_tile(C, tile_c, _MINMAX_BLOCK_ELEMS, x.dtype)
        needs_mask = (rest % tile_c != 0)
        kern = functools.partial(_lanefold_minmax_kernel, tile_c=tile_c,
                                 part_w=part_w, rest=rest,
                                 needs_mask=needs_mask)
        out_sh = jax.ShapeDtypeStruct((C, part_w), jnp.float32)
        pmin, pmax = pl.pallas_call(
            kern,
            out_shape=(out_sh, out_sh),
            grid=(pl.cdiv(C, tile_r), pl.cdiv(rest, tile_c)),
            in_specs=[pl.BlockSpec((tile_r, tile_c), lambda i, j: (i, j))],
            out_specs=(pl.BlockSpec((tile_r, part_w), lambda i, j: (i, 0)),
                       pl.BlockSpec((tile_r, part_w), lambda i, j: (i, 0))),
            compiler_params=pltpu.CompilerParams(
                dimension_semantics=("parallel", "arbitrary"),
                vmem_limit_bytes=_VMEM_LIMIT_BYTES),
        )(x2d)
        return jnp.min(pmin, axis=1), jnp.max(pmax, axis=1)
    elif x.ndim == 3:
        # channel dim -1 -> channels on the lane axis (lane-dense via k-fold)
        C = x.shape[-1]
        x2d, k = _channels_last_2d(x)
        R, c_eff = x2d.shape
        pmin, pmax = _minmax_partials(x2d, c_eff, x2d.size, x.dtype)
        mn = jnp.min(pmin.reshape(-1, k, C), axis=(0, 1))
        mx = jnp.max(pmax.reshape(-1, k, C), axis=(0, 1))
        return mn, mx
    else:
        raise NotImplementedError


@functools.partial(jax.jit, static_argnums=(3,))
def _qdq_tensorwise(x, delta, zero_point, n_levels):
    x2d, lanes, total = _as_lane_dense_2d(x)
    rows = x2d.shape[0]
    tile_r = _row_tile(rows, lanes, _QDQ_BLOCK_ELEMS, x.dtype)
    d = jnp.asarray(delta, jnp.float32).reshape(())
    z = jnp.asarray(zero_point, jnp.float32).reshape(())
    scale = jnp.stack([1.0 / d, d, -z, float(n_levels - 1) - z])
    y2d = pl.pallas_call(
        _tensorwise_qdq_kernel,
        out_shape=jax.ShapeDtypeStruct(x2d.shape, x.dtype),
        grid=(pl.cdiv(rows, tile_r),),
        in_specs=[pl.BlockSpec(memory_space=pltpu.MemorySpace.SMEM),
                  pl.BlockSpec((tile_r, lanes), lambda i: (i, 0))],
        out_specs=pl.BlockSpec((tile_r, lanes), lambda i: (i, 0)),
        compiler_params=pltpu.CompilerParams(
            dimension_semantics=("parallel",),
            vmem_limit_bytes=_VMEM_LIMIT_BYTES),
    )(scale, x2d)
    if rows * lanes != total:                  # rare un-aligned fallback
        return y2d.reshape(-1)[:total].reshape(x.shape)
    return y2d.reshape(x.shape)


@functools.partial(jax.jit, static_argnums=(3,))
def _qdq_channelwise(x, delta, zero_point, n_levels):
    d = jnp.asarray(delta, jnp.float32).reshape(-1)
    z = jnp.asarray(zero_point, jnp.float32).reshape(-1)
    inv_d = 1.0 / d
    lo = -z
    hi = float(n_levels - 1) - z
    if x.ndim in (2, 4):
        C = x.shape[0]
        x2d = x.reshape(C, -1)
        rest = x2d.shape[1]
        tile_c = rest if rest <= _MAX_COL_TILE else _MAX_COL_TILE
        tile_r = _row_tile(C, tile_c, _QDQ_BLOCK_ELEMS, x.dtype)
        grid = (pl.cdiv(C, tile_r), pl.cdiv(rest, tile_c))
        scales = jnp.stack([inv_d, d, lo, hi], axis=1)           # (C, 4)
        scale_spec = pl.BlockSpec((tile_r, 4), lambda i, j: (i, 0))
        x_spec = pl.BlockSpec((tile_r, tile_c), lambda i, j: (i, j))
        semantics = ("parallel", "parallel")
        kern = functools.partial(_channel_qdq_kernel, channel_axis=0)
    elif x.ndim == 3:
        x2d, k = _channels_last_2d(x)
        R, c_eff = x2d.shape
        if k > 1:                               # lane-dense: tile scales k times
            inv_d = jnp.tile(inv_d, k)
            d = jnp.tile(d, k)
            lo = jnp.tile(lo, k)
            hi = jnp.tile(hi, k)
        tile_r = _row_tile(R, c_eff, _QDQ_BLOCK_ELEMS, x.dtype)
        grid = (pl.cdiv(R, tile_r),)
        scales = jnp.stack([inv_d, d, lo, hi], axis=0)           # (4, Ceff)
        scale_spec = pl.BlockSpec((4, c_eff), lambda i: (0, 0))
        x_spec = pl.BlockSpec((tile_r, c_eff), lambda i: (i, 0))
        semantics = ("parallel",)
        kern = functools.partial(_channel_qdq_kernel, channel_axis=1)
    else:
        raise NotImplementedError
    y2d = pl.pallas_call(
        kern,
        out_shape=jax.ShapeDtypeStruct(x2d.shape, x.dtype),
        grid=grid,
        in_specs=[scale_spec, x_spec],
        out_specs=x_spec,
        compiler_params=pltpu.CompilerParams(
            dimension_semantics=semantics,
            vmem_limit_bytes=_VMEM_LIMIT_BYTES),
    )(scales, x2d)
    return y2d.reshape(x.shape)


# ----------------------------------------------------------------------------
# Module-equivalent wrapper (state handling mirrors the PyTorch module)
# ----------------------------------------------------------------------------
class BaseQuantizerPallas:
    def __init__(self, n_bits: int = 8, channel_wise: bool = False):
        assert 2 <= n_bits <= 8, "bitwidth not supported"
        self.n_bits = n_bits
        self.n_levels = 2 ** self.n_bits
        self.delta = None
        self.zero_point = None
        self.inited = False
        self.channel_wise = channel_wise

    def __repr__(self):
        return ("BaseQuantizerPallas(n_bits={}, inited={}, channel_wise={})"
                .format(self.n_bits, self.inited, self.channel_wise))

    def set_inited(self, inited: bool = True):
        self.inited = inited

    def init_quantization_scale(self, x, channel_wise: bool = False):
        n_minus_1 = float(self.n_levels - 1)
        if channel_wise:
            mn, mx = _minmax_channelwise(x)          # (C,) f32 each
            delta = (mx - mn) / n_minus_1
            zero_point = jnp.round(-mn / delta)
            if x.ndim == 4:
                shape = (-1, 1, 1, 1)
            elif x.ndim == 2:
                shape = (-1, 1)
            elif x.ndim == 3:
                shape = (1, 1, -1)
            else:
                raise NotImplementedError
            return delta.reshape(shape), zero_point.reshape(shape)
        else:
            mn, mx = _minmax_tensorwise(x)           # f32 scalars
            delta = (mx - mn) / n_minus_1
            zero_point = jnp.round(-mn / delta)
            return delta, zero_point

    def __call__(self, x):
        if self.inited is False:
            self.delta, self.zero_point = self.init_quantization_scale(
                x, self.channel_wise)
            self.inited = True
        if self.channel_wise:
            return _qdq_channelwise(x, self.delta, self.zero_point, self.n_levels)
        return _qdq_tensorwise(x, self.delta, self.zero_point, self.n_levels)


# ----------------------------------------------------------------------------
# Pure-JAX reference (mirrors the PyTorch forward; uses the same
# multiply-by-reciprocal form as the kernel)
# ----------------------------------------------------------------------------
def ref_base_quantizer(x, n_bits, channel_wise):
    n_levels = 2 ** n_bits
    xf = x.astype(jnp.float32)
    if not channel_wise:
        x_min = xf.min()
        x_max = xf.max()
        delta = (x_max - x_min) / float(n_levels - 1)
        zp = jnp.round(-x_min / delta)
    else:
        if x.ndim in (2, 4):
            axes = tuple(range(1, x.ndim))
            x_min = xf.min(axis=axes)
            x_max = xf.max(axis=axes)
            shape = (-1,) + (1,) * (x.ndim - 1)
        elif x.ndim == 3:
            x_min = xf.min(axis=(0, 1))
            x_max = xf.max(axis=(0, 1))
            shape = (1, 1, -1)
        else:
            raise NotImplementedError
        delta = ((x_max - x_min) / float(n_levels - 1)).reshape(shape)
        zp = jnp.round(-x_min.reshape(shape) / delta)
    x_int = jnp.round(xf * (1.0 / delta)) + zp
    x_q = jnp.clip(x_int, 0.0, float(n_levels - 1))
    y = (x_q - zp) * delta
    return y.astype(x.dtype)


# ----------------------------------------------------------------------------
if __name__ == "__main__":
    key = jax.random.PRNGKey(0)
    k1, k2, k3, k4 = jax.random.split(key, 4)

    # 1) tensor-wise (default), activation-like NCHW input
    x = jax.random.normal(k1, (2, 4, 16, 16), dtype=jnp.float32)
    q = BaseQuantizerPallas(n_bits=8, channel_wise=False)
    y = jax.block_until_ready(q(x))
    np.testing.assert_allclose(np.asarray(y),
                               np.asarray(ref_base_quantizer(x, 8, False)),
                               rtol=1e-5, atol=1e-5)

    # 2) channel-wise, conv-weight-like OIHW tensor (channel dim 0)
    w = jax.random.normal(k2, (8, 4, 3, 3), dtype=jnp.float32)
    qc = BaseQuantizerPallas(n_bits=4, channel_wise=True)
    yw = jax.block_until_ready(qc(w))
    np.testing.assert_allclose(np.asarray(yw),
                               np.asarray(ref_base_quantizer(w, 4, True)),
                               rtol=1e-5, atol=1e-5)

    # 3) channel-wise, 3D activation (channels last) — lane-dense k-fold path
    a = jax.random.normal(k3, (4, 8, 32), dtype=jnp.float32)
    q3 = BaseQuantizerPallas(n_bits=8, channel_wise=True)
    ya = jax.block_until_ready(q3(a))
    np.testing.assert_allclose(np.asarray(ya),
                               np.asarray(ref_base_quantizer(a, 8, True)),
                               rtol=1e-5, atol=1e-5)

    # 4) channel-wise, 2D linear weight (channel dim 0)
    m = jax.random.normal(k4, (16, 64), dtype=jnp.float32)
    q2 = BaseQuantizerPallas(n_bits=6, channel_wise=True)
    ym = jax.block_until_ready(q2(m))
    np.testing.assert_allclose(np.asarray(ym),
                               np.asarray(ref_base_quantizer(m, 6, True)),
                               rtol=1e-5, atol=1e-5)

    print("KERNEL_OK")
</pallas_src>

<mosaic_0001>
module attributes {stable_mosaic.version = 11 : i64} {
  func.func @_rowfold_minmax_kernel(%arg0: i32, %arg1: i32, %arg2: memref<1x2048xf32, #tpu.memory_space<vmem>>, %arg3: memref<1x2048xf32, #tpu.memory_space<vmem>>, %arg4: memref<1x2048xf32, #tpu.memory_space<vmem>>) attributes {dimension_semantics = [#tpu.dimension_semantics<parallel>, #tpu.dimension_semantics<arbitrary>], iteration_bounds = array<i64: 1, 1>, scalar_prefetch = 0 : i64, scratch_operands = 0 : i64, tpu.core_type = #tpu.core_type<tc>, window_params = [{transform_indices = @transform_0, window_bounds = array<i64: 1, 2048>}, {transform_indices = @transform_1, window_bounds = array<i64: 1, 2048>}, {transform_indices = @transform_2, window_bounds = array<i64: 1, 2048>}]} {
    %c0 = arith.constant 0 : index
    %c0_0 = arith.constant 0 : index
    %0 = vector.load %arg2[%c0, %c0_0] : memref<1x2048xf32, #tpu.memory_space<vmem>>, vector<1x2048xf32>
    %c0_i32 = arith.constant 0 : i32
    %1 = arith.cmpi eq, %arg1, %c0_i32 : i32
    %2 = arith.extui %1 : i1 to i32
    %c0_i32_1 = arith.constant 0 : i32
    %3 = arith.cmpi ne, %2, %c0_i32_1 : i32
    scf.if %3 {
      %c0_4 = arith.constant 0 : index
      %c0_5 = arith.constant 0 : index
      %7 = vector.load %arg3[%c0_4, %c0_5] : memref<1x2048xf32, #tpu.memory_space<vmem>>, vector<1x2048xf32>
      tpu.vector_store %arg3[%c0_4, %c0_5], %0 {strides = array<i32>} : memref<1x2048xf32, #tpu.memory_space<vmem>>, vector<1x2048xf32>,
      %c0_6 = arith.constant 0 : index
      %c0_7 = arith.constant 0 : index
      %8 = vector.load %arg4[%c0_6, %c0_7] : memref<1x2048xf32, #tpu.memory_space<vmem>>, vector<1x2048xf32>
      tpu.vector_store %arg4[%c0_6, %c0_7], %0 {strides = array<i32>} : memref<1x2048xf32, #tpu.memory_space<vmem>>, vector<1x2048xf32>,
    } else {
    }
    %c0_i32_2 = arith.constant 0 : i32
    %4 = arith.cmpi sgt, %arg1, %c0_i32_2 : i32
    %5 = arith.extui %4 : i1 to i32
    %c0_i32_3 = arith.constant 0 : i32
    %6 = arith.cmpi ne, %5, %c0_i32_3 : i32
    scf.if %6 {
      %c0_4 = arith.constant 0 : index
      %c0_5 = arith.constant 0 : index
      %7 = vector.load %arg3[%c0_4, %c0_5] : memref<1x2048xf32, #tpu.memory_space<vmem>>, vector<1x2048xf32>
      %8 = arith.minimumf %7, %0 : vector<1x2048xf32>
      %c0_6 = arith.constant 0 : index
      %c0_7 = arith.constant 0 : index
      %9 = vector.load %arg3[%c0_6, %c0_7] : memref<1x2048xf32, #tpu.memory_space<vmem>>, vector<1x2048xf32>
      tpu.vector_store %arg3[%c0_6, %c0_7], %8 {strides = array<i32>} : memref<1x2048xf32, #tpu.memory_space<vmem>>, vector<1x2048xf32>,
      %c0_8 = arith.constant 0 : index
      %c0_9 = arith.constant 0 : index
      %10 = vector.load %arg4[%c0_8, %c0_9] : memref<1x2048xf32, #tpu.memory_space<vmem>>, vector<1x2048xf32>
      %11 = arith.maximumf %10, %0 : vector<1x2048xf32>
      %c0_10 = arith.constant 0 : index
      %c0_11 = arith.constant 0 : index
      %12 = vector.load %arg4[%c0_10, %c0_11] : memref<1x2048xf32, #tpu.memory_space<vmem>>, vector<1x2048xf32>
      tpu.vector_store %arg4[%c0_10, %c0_11], %11 {strides = array<i32>} : memref<1x2048xf32, #tpu.memory_space<vmem>>, vector<1x2048xf32>,
    } else {
    }
    return
  }
  func.func @transform_0(%arg0: i32, %arg1: i32) -> (i32, i32) {
    %c1_i32 = arith.constant 1 : i32
    %0 = arith.muli %arg0, %c1_i32 : i32
    %1 = arith.addi %0, %arg1 : i32
    %c0_i32 = arith.constant 0 : i32
    %c0_i32_0 = arith.constant 0 : i32
    return %1, %c0_i32 : i32, i32
  }
  func.func @transform_1(%arg0: i32, %arg1: i32) -> (i32, i32) {
    %c0_i32 = arith.constant 0 : i32
    %c0_i32_0 = arith.constant 0 : i32
    return %arg0, %c0_i32 : i32, i32
  }
  func.func @transform_2(%arg0: i32, %arg1: i32) -> (i32, i32) {
    %c0_i32 = arith.constant 0 : i32
    %c0_i32_0 = arith.constant 0 : i32
    return %arg0, %c0_i32 : i32, i32
  }
}

</mosaic_0001>

<bundles_post_ra>
// kernel: _minmax_tensorwise.1
= control target key start
LH: loop header
LB: loop body
LE: loop exit
PB: predicated region body
PF: predicated region fallthrough
CT: control target
= control target key end

     0   :  { %s100_s0 = inlined_call_operand.vmem [shape: f32[1,2048], index: 0, kind: input, shape index: {}]   ;;  %s101_s1 = inlined_call_operand.vmem [shape: f32[1,2048], index: 1, kind: output, shape index: {0}]   ;;  %s102_s2 = inlined_call_operand.vmem [shape: f32[1,2048], index: 2, kind: output, shape index: {1}]  }
   0x1   :  { %v27_v0 = vld [vmem:[%s100_s0] sm:$0xff]  ;;  %v28_v1 = vld [vmem:[%s100_s0 + $0x8] sm:$0xff] }
   0x2   :  { %33 = vst [vmem:[%s101_s1] sm:$0xff] %v27_v0  ;;  %34 = vst [vmem:[%s101_s1 + $0x8] sm:$0xff] %v28_v1 }
   0x3   :  { %35 = vst [vmem:[%s102_s2] sm:$0xff] %v27_v0  ;;  %36 = vst [vmem:[%s102_s2 + $0x8] sm:$0xff] %v28_v1 }

</bundles_post_ra>
